<compile_context>
chip_gen: v7x
topology: tpu7x:2x2x1
jax: 0.10.0
libtpu: 0.0.40
codegen_flags: <defaults>
</compile_context>

<pallas_src>
import functools

import jax
import jax.numpy as jnp
from jax import lax
from jax.experimental import pallas as pl
from jax.experimental.pallas import tpu as pltpu

_LANE = 128      # feature dims padded to multiples of this (lane-dense)
_BN_EPS = 1e-5


def _round_up(n, m):
    return ((n + m - 1) // m) * m


def _full_spec(shape):
    # Whole-array block (block_shape == array shape satisfies the tiling rule).
    return pl.BlockSpec(shape, lambda: (0,) * len(shape))


def _make_fused_mlp_kernel(apply_act, batch, batch_pad, bf16_matmul):
    """Build a kernel computing the whole MLP stack in one invocation.

    apply_act[i] == True  -> layer i is Linear -> BatchNorm1d(train) -> Sigmoid
    apply_act[i] == False -> layer i is Linear only (last layer, last_activation=False)

    Per layer the kernel receives two refs:
      w_ref   : [In_pad, Out_pad]  pre-transposed weight (bf16 if bf16_matmul else f32)
      vec_ref : [8, Out_pad] f32   row 0 = bias, row 1 = gamma, row 2 = beta
    """
    n_layers = len(apply_act)

    def kernel(*refs):
        x_ref = refs[0]
        out_ref = refs[-1]
        prm = refs[1:-1]                                  # 2 refs per layer: w, vec

        need_mask = batch_pad != batch
        if need_mask:
            # Hoisted out of the layer loop (JAX does not CSE broadcast_in_dim).
            rows = lax.broadcasted_iota(jnp.int32, (batch_pad, 1), 0)
            mask = (rows < batch).astype(jnp.float32)     # [B_pad, 1]
        inv_batch = jnp.float32(1.0 / batch)

        h = x_ref[...]                                    # f32 [B_pad, D0_pad]
        for i in range(n_layers):
            w_ref, vec_ref = prm[2 * i: 2 * i + 2]
            w = w_ref[...]                                # [In_pad, Out_pad]
            vec = vec_ref[...]                            # [8, Out_pad] f32
            b = vec[0:1, :]
            g = vec[1:2, :]
            be = vec[2:3, :]

            # Linear on the MXU (bf16 operands pre-cast on host, f32 accumulation).
            if bf16_matmul:
                y = jnp.dot(h.astype(jnp.bfloat16), w,
                            preferred_element_type=jnp.float32)
            else:
                # NOTE: f32 operands lower to a multi-pass MXU emulation (~3-6x passes);
                # kept only as a debugging fallback.
                y = jnp.dot(h, w, preferred_element_type=jnp.float32)
            y = y + b                                     # [B_pad, Out_pad]

            if apply_act[i]:
                # BatchNorm1d training mode: batch mean, biased batch variance, eps=1e-5.
                if need_mask:
                    mean = jnp.sum(y * mask, axis=0, keepdims=True) * inv_batch
                    d = (y - mean) * mask                 # reused for var AND y_hat
                    var = jnp.sum(d * d, axis=0, keepdims=True) * inv_batch
                else:
                    mean = jnp.mean(y, axis=0, keepdims=True)
                    d = y - mean
                    var = jnp.mean(d * d, axis=0, keepdims=True)
                y_hat = d * lax.rsqrt(var + _BN_EPS)
                h = jax.nn.sigmoid(y_hat * g + be)        # exp on EUP
            else:
                h = y

        out_ref[...] = h.astype(out_ref.dtype)

    return kernel


def init_mlp_params(key, hidden_size):
    """PyTorch-style parameters.

    Linear_i: weight [out, in], bias [1, out]  (uniform(-1/sqrt(in), 1/sqrt(in)))
    BatchNorm_i: gamma = ones[1, out], beta = zeros[1, out]
    """
    params = []
    for i in range(len(hidden_size) - 1):
        in_dim, out_dim = hidden_size[i], hidden_size[i + 1]
        key, kw, kb = jax.random.split(key, 3)
        bound = 1.0 / float(in_dim) ** 0.5
        w = jax.random.uniform(kw, (out_dim, in_dim), jnp.float32, -bound, bound)
        b = jax.random.uniform(kb, (1, out_dim), jnp.float32, -bound, bound)
        gamma = jnp.ones((1, out_dim), jnp.float32)
        beta = jnp.zeros((1, out_dim), jnp.float32)
        params.append((w, b, gamma, beta))
    return params


def prepare_mlp_params(params, hidden_size, bf16_matmul=True):
    """One-time host prep.

    * Weights transposed to [In, Out], zero-padded to 128-lane multiples, pre-cast to
      bf16 when bf16_matmul (halves weight DMA bytes and VMEM residency).
    * bias/gamma/beta packed into one [8, Out_pad] f32 slab per layer (rows 0/1/2).

    The zero pad region is a correctness invariant: padded input lanes of the next
    layer hit exactly-zero weight rows.
    """
    w_dtype = jnp.bfloat16 if bf16_matmul else jnp.float32
    prepared = []
    for (w, b, gamma, beta), in_dim, out_dim in zip(params, hidden_size[:-1], hidden_size[1:]):
        in_p = _round_up(in_dim, _LANE)
        out_p = _round_up(out_dim, _LANE)
        wt = (jnp.zeros((in_p, out_p), jnp.float32)
              .at[:in_dim, :out_dim].set(w.T)).astype(w_dtype)
        vec = jnp.zeros((8, out_p), jnp.float32)
        vec = vec.at[0, :out_dim].set(b[0])
        vec = vec.at[1, :out_dim].set(gamma[0])
        vec = vec.at[2, :out_dim].set(beta[0])
        prepared.append((wt, vec))
    return tuple(prepared)


@functools.partial(jax.jit, static_argnums=(2, 3, 4))
def mlp_forward(x, prepared_params, hidden_size, last_activation=True, bf16_matmul=True):
    """Forward pass. x: [B, hidden_size[0]] f32. prepared_params from prepare_mlp_params."""
    n_layers = len(hidden_size) - 1
    batch = x.shape[0]
    # bf16 LHS packs 16 rows per tile; f32 packs 8.
    sublane = 16 if bf16_matmul else 8
    batch_pad = _round_up(max(batch, 1), sublane)
    in0 = hidden_size[0]
    in0_p = _round_up(in0, _LANE)
    out_last = hidden_size[-1]
    out_last_p = _round_up(out_last, _LANE)

    apply_act = tuple((i < n_layers - 1) or last_activation for i in range(n_layers))

    # Pad input once to a lane/sublane-dense slab.
    x_p = jnp.pad(x.astype(jnp.float32), ((0, batch_pad - batch), (0, in0_p - in0)))

    flat_inputs = [x_p]
    for layer in prepared_params:
        flat_inputs.extend(layer)

    in_specs = [_full_spec(a.shape) for a in flat_inputs]
    out_shape = jax.ShapeDtypeStruct((batch_pad, out_last_p), jnp.float32)

    # Scheduler hints: flops/transcendentals from the TRUE (unpadded) dims;
    # bytes_accessed from the actual padded arrays that move.
    flops = 0
    trans = 0
    for i in range(n_layers):
        flops += 2 * batch * hidden_size[i] * hidden_size[i + 1]
        if apply_act[i]:
            trans += batch * hidden_size[i + 1]
    in_bytes = sum(int(a.size) * a.dtype.itemsize for a in flat_inputs)
    out_bytes = batch_pad * out_last_p * 4

    # VMEM budget: all inputs + output resident (single grid-less iteration, so no 2x
    # double-buffer factor) + slack for f32 activations, capped by chip capacity.
    act_bytes = 4 * batch_pad * max(_round_up(d, _LANE) for d in hidden_size)
    need = in_bytes + out_bytes + 4 * act_bytes + (2 << 20)
    try:
        capacity = pltpu.get_tpu_info().vmem_capacity_bytes   # 64 MiB v7x, 128 MiB v5e/v6e
    except Exception:
        capacity = 64 << 20
    vmem_limit = int(min(max(need, 4 << 20), int(0.7 * capacity)))

    kernel = _make_fused_mlp_kernel(apply_act, batch, batch_pad, bf16_matmul)

    out_padded = pl.pallas_call(
        kernel,
        out_shape=out_shape,
        in_specs=in_specs,
        out_specs=_full_spec((batch_pad, out_last_p)),
        compiler_params=pltpu.CompilerParams(vmem_limit_bytes=vmem_limit),
        cost_estimate=pl.CostEstimate(flops=flops, transcendentals=trans,
                                      bytes_accessed=in_bytes + out_bytes),
    )(*flat_inputs)

    return out_padded[:batch, :out_last]


def mlp_reference(x, params, last_activation=True, bf16_matmul=False):
    """Pure-JAX reference (PyTorch semantics; optional bf16 matmul operands)."""
    n_layers = len(params)
    h = x
    for i, (w, b, gamma, beta) in enumerate(params):
        if bf16_matmul:
            y = jnp.dot(h.astype(jnp.bfloat16), w.T.astype(jnp.bfloat16),
                        preferred_element_type=jnp.float32) + b
        else:
            y = h @ w.T + b
        if (i < n_layers - 1) or last_activation:
            mean = jnp.mean(y, axis=0, keepdims=True)
            var = jnp.mean((y - mean) ** 2, axis=0, keepdims=True)
            y = (y - mean) * lax.rsqrt(var + _BN_EPS)
            y = y * gamma + beta
            y = jax.nn.sigmoid(y)
        h = y
    return h


if __name__ == "__main__":
    key = jax.random.PRNGKey(0)
    hidden_size = (16, 32, 8)   # MLP((16, 32, 8), last_activation=True)
    batch = 8

    k_x, k_p = jax.random.split(key)
    x = jax.random.normal(k_x, (batch, hidden_size[0]), jnp.float32)
    params = init_mlp_params(k_p, hidden_size)
    prepared = prepare_mlp_params(params, hidden_size, bf16_matmul=True)

    out = mlp_forward(x, prepared, hidden_size, True, True)
    out = jax.block_until_ready(out)
    assert out.shape == (batch, hidden_size[-1])

    # Tight check against a reference that uses the same bf16-operand matmul.
    ref_bf16 = mlp_reference(x, params, last_activation=True, bf16_matmul=True)
    assert jnp.allclose(out, ref_bf16, atol=1e-3, rtol=1e-3), "mismatch vs bf16 reference"

    # Loose check against the full-f32 (PyTorch-semantics) reference: only the MXU
    # operand dtype differs, BN re-normalizes, so error stays small.
    ref_f32 = mlp_reference(x, params, last_activation=True, bf16_matmul=False)
    assert jnp.allclose(out, ref_f32, atol=3e-2, rtol=3e-2), "mismatch vs f32 reference"

    print("KERNEL_OK")
</pallas_src>

<mosaic_0001>
module attributes {stable_mosaic.version = 11 : i64} {
  func.func @kernel(%arg0: memref<16x128xf32, #tpu.memory_space<vmem>>, %arg1: memref<128x128xbf16, #tpu.memory_space<vmem>>, %arg2: memref<8x128xf32, #tpu.memory_space<vmem>>, %arg3: memref<128x128xbf16, #tpu.memory_space<vmem>>, %arg4: memref<8x128xf32, #tpu.memory_space<vmem>>, %arg5: memref<16x128xf32, #tpu.memory_space<vmem>>) attributes {dimension_semantics = [], scalar_prefetch = 0 : i64, scratch_operands = 0 : i64, tpu.core_type = #tpu.core_type<tc>} {
    %0 = tpu.iota {dimensions = array<i32: 0>} : vector<16x1xi32>
    %c8_i32 = arith.constant 8 : i32
    %1 = vector.broadcast %c8_i32 : i32 to vector<16x1xi32>
    %2 = arith.cmpi slt, %0, %1 : vector<16x1xi32>
    %3 = arith.extui %2 : vector<16x1xi1> to vector<16x1xi32>
    %4 = arith.sitofp %3 : vector<16x1xi32> to vector<16x1xf32>
    %c0 = arith.constant 0 : index
    %c0_0 = arith.constant 0 : index
    %5 = vector.load %arg0[%c0, %c0_0] : memref<16x128xf32, #tpu.memory_space<vmem>>, vector<16x128xf32>
    %c0_1 = arith.constant 0 : index
    %c0_2 = arith.constant 0 : index
    %6 = vector.load %arg1[%c0_1, %c0_2] : memref<128x128xbf16, #tpu.memory_space<vmem>>, vector<128x128xbf16>
    %c0_3 = arith.constant 0 : index
    %c0_4 = arith.constant 0 : index
    %7 = vector.load %arg2[%c0_3, %c0_4] : memref<8x128xf32, #tpu.memory_space<vmem>>, vector<8x128xf32>
    %8 = vector.extract_strided_slice %7 {offsets = [0, 0], sizes = [1, 128], strides = [1, 1]} : vector<8x128xf32> to vector<1x128xf32>
    %9 = vector.extract_strided_slice %7 {offsets = [1, 0], sizes = [1, 128], strides = [1, 1]} : vector<8x128xf32> to vector<1x128xf32>
    %10 = vector.extract_strided_slice %7 {offsets = [2, 0], sizes = [1, 128], strides = [1, 1]} : vector<8x128xf32> to vector<1x128xf32>
    %11 = arith.truncf %5 : vector<16x128xf32> to vector<16x128xbf16>
    %cst = arith.constant dense<0.000000e+00> : vector<16x128xf32>
    %12 = tpu.matmul %11, %6, %cst {dimension_numbers = #tpu.dot_dimension_numbers<[1], [0], [0], [1], [0, 0, 1, 1], [], []>} : vector<16x128xbf16>, vector<128x128xbf16>, vector<16x128xf32> -> vector<16x128xf32>
    %13 = vector.broadcast %8 : vector<1x128xf32> to vector<16x128xf32>
    %14 = arith.addf %12, %13 : vector<16x128xf32>
    %15 = vector.broadcast %4 : vector<16x1xf32> to vector<16x128xf32>
    %16 = arith.mulf %14, %15 : vector<16x128xf32>
    %cst_5 = arith.constant dense<0.000000e+00> : vector<128xf32>
    %17 = vector.multi_reduction <add>, %16, %cst_5 [0] : vector<16x128xf32> to vector<128xf32>
    %18 = vector.shape_cast %17 : vector<128xf32> to vector<1x128xf32>
    %cst_6 = arith.constant 1.250000e-01 : f32
    %19 = vector.broadcast %cst_6 : f32 to vector<1x128xf32>
    %20 = arith.mulf %18, %19 : vector<1x128xf32>
    %21 = vector.broadcast %20 : vector<1x128xf32> to vector<16x128xf32>
    %22 = arith.subf %14, %21 : vector<16x128xf32>
    %23 = vector.broadcast %4 : vector<16x1xf32> to vector<16x128xf32>
    %24 = arith.mulf %22, %23 : vector<16x128xf32>
    %25 = arith.mulf %24, %24 : vector<16x128xf32>
    %cst_7 = arith.constant dense<0.000000e+00> : vector<128xf32>
    %26 = vector.multi_reduction <add>, %25, %cst_7 [0] : vector<16x128xf32> to vector<128xf32>
    %27 = vector.shape_cast %26 : vector<128xf32> to vector<1x128xf32>
    %cst_8 = arith.constant 1.250000e-01 : f32
    %28 = vector.broadcast %cst_8 : f32 to vector<1x128xf32>
    %29 = arith.mulf %27, %28 : vector<1x128xf32>
    %cst_9 = arith.constant 9.99999974E-6 : f32
    %30 = vector.broadcast %cst_9 : f32 to vector<1x128xf32>
    %31 = arith.addf %29, %30 : vector<1x128xf32>
    %32 = math.rsqrt %31 : vector<1x128xf32>
    %33 = vector.broadcast %32 : vector<1x128xf32> to vector<16x128xf32>
    %34 = arith.mulf %24, %33 : vector<16x128xf32>
    %35 = vector.broadcast %9 : vector<1x128xf32> to vector<16x128xf32>
    %36 = arith.mulf %34, %35 : vector<16x128xf32>
    %37 = vector.broadcast %10 : vector<1x128xf32> to vector<16x128xf32>
    %38 = arith.addf %36, %37 : vector<16x128xf32>
    %39 = arith.negf %38 : vector<16x128xf32>
    %40 = math.exp %39 : vector<16x128xf32>
    %cst_10 = arith.constant 1.000000e+00 : f32
    %41 = vector.broadcast %cst_10 : f32 to vector<16x128xf32>
    %42 = arith.addf %41, %40 : vector<16x128xf32>
    %43 = arith.divf %41, %42 : vector<16x128xf32>
    %c0_11 = arith.constant 0 : index
    %c0_12 = arith.constant 0 : index
    %44 = vector.load %arg3[%c0_11, %c0_12] : memref<128x128xbf16, #tpu.memory_space<vmem>>, vector<128x128xbf16>
    %c0_13 = arith.constant 0 : index
    %c0_14 = arith.constant 0 : index
    %45 = vector.load %arg4[%c0_13, %c0_14] : memref<8x128xf32, #tpu.memory_space<vmem>>, vector<8x128xf32>
    %46 = vector.extract_strided_slice %45 {offsets = [0, 0], sizes = [1, 128], strides = [1, 1]} : vector<8x128xf32> to vector<1x128xf32>
    %47 = vector.extract_strided_slice %45 {offsets = [1, 0], sizes = [1, 128], strides = [1, 1]} : vector<8x128xf32> to vector<1x128xf32>
    %48 = vector.extract_strided_slice %45 {offsets = [2, 0], sizes = [1, 128], strides = [1, 1]} : vector<8x128xf32> to vector<1x128xf32>
    %49 = arith.truncf %43 : vector<16x128xf32> to vector<16x128xbf16>
    %cst_15 = arith.constant dense<0.000000e+00> : vector<16x128xf32>
    %50 = tpu.matmul %49, %44, %cst_15 {dimension_numbers = #tpu.dot_dimension_numbers<[1], [0], [0], [1], [0, 0, 1, 1], [], []>} : vector<16x128xbf16>, vector<128x128xbf16>, vector<16x128xf32> -> vector<16x128xf32>
    %51 = vector.broadcast %46 : vector<1x128xf32> to vector<16x128xf32>
    %52 = arith.addf %50, %51 : vector<16x128xf32>
    %53 = vector.broadcast %4 : vector<16x1xf32> to vector<16x128xf32>
    %54 = arith.mulf %52, %53 : vector<16x128xf32>
    %cst_16 = arith.constant dense<0.000000e+00> : vector<128xf32>
    %55 = vector.multi_reduction <add>, %54, %cst_16 [0] : vector<16x128xf32> to vector<128xf32>
    %56 = vector.shape_cast %55 : vector<128xf32> to vector<1x128xf32>
    %cst_17 = arith.constant 1.250000e-01 : f32
    %57 = vector.broadcast %cst_17 : f32 to vector<1x128xf32>
    %58 = arith.mulf %56, %57 : vector<1x128xf32>
    %59 = vector.broadcast %58 : vector<1x128xf32> to vector<16x128xf32>
    %60 = arith.subf %52, %59 : vector<16x128xf32>
    %61 = vector.broadcast %4 : vector<16x1xf32> to vector<16x128xf32>
    %62 = arith.mulf %60, %61 : vector<16x128xf32>
    %63 = arith.mulf %62, %62 : vector<16x128xf32>
    %cst_18 = arith.constant dense<0.000000e+00> : vector<128xf32>
    %64 = vector.multi_reduction <add>, %63, %cst_18 [0] : vector<16x128xf32> to vector<128xf32>
    %65 = vector.shape_cast %64 : vector<128xf32> to vector<1x128xf32>
    %cst_19 = arith.constant 1.250000e-01 : f32
    %66 = vector.broadcast %cst_19 : f32 to vector<1x128xf32>
    %67 = arith.mulf %65, %66 : vector<1x128xf32>
    %cst_20 = arith.constant 9.99999974E-6 : f32
    %68 = vector.broadcast %cst_20 : f32 to vector<1x128xf32>
    %69 = arith.addf %67, %68 : vector<1x128xf32>
    %70 = math.rsqrt %69 : vector<1x128xf32>
    %71 = vector.broadcast %70 : vector<1x128xf32> to vector<16x128xf32>
    %72 = arith.mulf %62, %71 : vector<16x128xf32>
    %73 = vector.broadcast %47 : vector<1x128xf32> to vector<16x128xf32>
    %74 = arith.mulf %72, %73 : vector<16x128xf32>
    %75 = vector.broadcast %48 : vector<1x128xf32> to vector<16x128xf32>
    %76 = arith.addf %74, %75 : vector<16x128xf32>
    %77 = arith.negf %76 : vector<16x128xf32>
    %78 = math.exp %77 : vector<16x128xf32>
    %cst_21 = arith.constant 1.000000e+00 : f32
    %79 = vector.broadcast %cst_21 : f32 to vector<16x128xf32>
    %80 = arith.addf %79, %78 : vector<16x128xf32>
    %81 = arith.divf %79, %80 : vector<16x128xf32>
    %c0_22 = arith.constant 0 : index
    %c0_23 = arith.constant 0 : index
    %82 = vector.load %arg5[%c0_22, %c0_23] : memref<16x128xf32, #tpu.memory_space<vmem>>, vector<16x128xf32>
    tpu.vector_store %arg5[%c0_22, %c0_23], %81 {strides = array<i32>} : memref<16x128xf32, #tpu.memory_space<vmem>>, vector<16x128xf32>,
    return
  }
}

</mosaic_0001>

<bundles_post_ra>
// kernel: mlp_forward.1
= control target key start
LH: loop header
LB: loop body
LE: loop exit
PB: predicated region body
PF: predicated region fallthrough
CT: control target
= control target key end

     0   :  { %10 = vsyncpa [#allocation3], 0  ;;  %s645_s0 = inlined_call_operand.vmem [shape: f32[16,128], index: 0, kind: input, shape index: {}]   ;;  %s646_s1 = inlined_call_operand.hbm [shape: bf16[128,128], index: 1, kind: input, shape index: {}]   ;;  %s647_s2 = inlined_call_operand.vmem [shape: f32[8,128], index: 2, kind: input, shape index: {}]   ;;  %s648_s3 = inlined_call_operand.hbm [shape: bf16[128,128], index: 3, kind: input, shape index: {}]   ;;  %s649_s4 = inlined_call_operand.vmem [shape: f32[8,128], index: 4, kind: input, shape index: {}]   ;;  %s650_s5 = inlined_call_operand.vmem [shape: f32[16,128], index: 5, kind: output, shape index: {}]  }
   0x1   :  { %11 = vsyncpa [#allocation5], 0  ;;  %s562_s18 = smov [#allocation2]   ;;  %s514_s22 = scalar_lea.hbm %s646_s1, 1024 }
   0x2   :  { %s19_s19 = sshll.u32 %s562_s18, 4  ;;  %p515_p0 = scmp.ne.s32.totalorder %s646_s1, %s514_s22  ;;  %s20_s19 = int_to_ptr.vmem [resolvable:$true] %s19_s19 }
   0x3   :  { %p518_p1 = scmp.lt.u32.totalorder %s514_s22, %s646_s1 }
   0x5   :  { %p520_p2 = pnand %p518_p1, %p515_p0 }
   0x7   :  { %523 = shalt.err (!%p520_p2)
}
   0x8   :  { %s524_s27 = scalar_lea.vmem %s20_s19, 1024  ;;  %p529_p4 = scmp.lt.s32.totalorder %s20_s19, %s20_s19 }
   0x9   :  { %p525_p3 = scmp.ne.s32.totalorder %s20_s19, %s524_s27  ;;  %p530_p5 = scmp.lt.s32.totalorder %s524_s27, %s524_s27 }
   0xb   :  { %p531_p6 = por %p530_p5, %p529_p4 }
   0xd   :  { %p532_p7 = pnand %p531_p6, %p525_p3 }
   0xf   :  { %535 = shalt.err (!%p532_p7)
}
  0x10   :  { %s563_s28 = smov 64   ;;  %s564_s29 = smov 4  }
  0x11   :  { %25 = dma.hbm_to_vmem [thread:$0]  %s646_s1, 1024, %s20_s19, [#allocation3], %s563_s28, %s563_s28, %s564_s29  }
  0x12   :  { %s565_s7 = smov [#allocation4]   ;;  %s536_s11 = scalar_lea.hbm %s648_s3, 1024 }
  0x13   :  { %s33_s8 = sshll.u32 %s565_s7, 4  ;;  %p537_p8 = scmp.ne.s32.totalorder %s648_s3, %s536_s11  ;;  %s34_s8 = int_to_ptr.vmem [resolvable:$true] %s33_s8 }
  0x14   :  { %p540_p9 = scmp.lt.u32.totalorder %s536_s11, %s648_s3 }
  0x16   :  { %p542_p10 = pnand %p540_p9, %p537_p8 }
  0x18   :  { %545 = shalt.err (!%p542_p10)
}
  0x19   :  { %s546_s16 = scalar_lea.vmem %s34_s8, 1024  ;;  %p551_p12 = scmp.lt.s32.totalorder %s34_s8, %s34_s8 }
  0x1a   :  { %p547_p11 = scmp.ne.s32.totalorder %s34_s8, %s546_s16  ;;  %p552_p13 = scmp.lt.s32.totalorder %s546_s16, %s546_s16 }
  0x1c   :  { %p553_p0 = por %p552_p13, %p551_p12 }
  0x1e   :  { %p554_p1 = pnand %p553_p0, %p547_p11 }
  0x20   :  { %557 = shalt.err (!%p554_p1)
}
  0x21   :  { %39 = dma.hbm_to_vmem [thread:$0]  %s648_s3, 1024, %s34_s8, [#allocation5], %s563_s28, %s563_s28, %s564_s29  }
  0x22   :  { %558 = dma.done.wait [#allocation3], 1024  }
  0x23   :  { %559 = vsyncadd [#allocation3], 4294966272 }
  0x24   :  { %560 = dma.done.wait [#allocation5], 1024  }
  0x25   :  { %561 = vsyncadd [#allocation5], 4294966272  ;;  %v566_v0 = vmov 0.0   ;;  %vm567_vm0 = vmmov 0   ;;  %v478_v1 = vld [vmem:[#allocation2] sm:$0xff]   ;;  %v479_v2 = vld [vmem:[#allocation2 + $0x8] sm:$0xff]   ;;  %v78_v20 = vlaneseq }
  0x26   :  { %432 = vmatprep.subr.bf16.mxu0 %v566_v0  ;;  %448 = vmatprep.mubr.msk.bf16.mxu0 %vm567_vm0, %v566_v0  ;;  %v480_v3 = vld [vmem:[#allocation2 + $0x10] sm:$0xff]   ;;  %v481_v4 = vld [vmem:[#allocation2 + $0x18] sm:$0xff]   ;;  %v482_v5 = vld [vmem:[#allocation2 + $0x20] sm:$0xff]  }
  0x27   :  { %452 = vmatprep.subr.bf16.mxu1 %v566_v0  ;;  %468 = vmatprep.mubr.msk.bf16.mxu1 %vm567_vm0, %v566_v0  ;;  %v483_v6 = vld [vmem:[#allocation2 + $0x28] sm:$0xff]   ;;  %v484_v7 = vld [vmem:[#allocation2 + $0x30] sm:$0xff]   ;;  %v485_v8 = vld [vmem:[#allocation2 + $0x38] sm:$0xff]   ;;  %v628_v21 = vshrl.u32 %v78_v20, 7 }
  0x28   :  { %433 = vmatpush3.bf16.msra.mxu0 %v478_v1  ;;  %v58_v9 = vld [vmem:[%s645_s0] sm:$0xff]  ;;  %v59_v10 = vld [vmem:[%s645_s0 + $0x8] sm:$0xff]  ;;  %v488_v14 = vld [vmem:[#allocation4 + $0x10] sm:$0xff]  }
  0x29   :  { %434 = vmatprep.subr.bf16.mxu0 %v566_v0  ;;  %v77_v11 = vpack.c.bf16 %v59_v10, %v58_v9  ;;  %v486_v12 = vld [vmem:[#allocation4] sm:$0xff]   ;;  %v487_v13 = vld [vmem:[#allocation4 + $0x8] sm:$0xff]   ;;  %v489_v15 = vld [vmem:[#allocation4 + $0x18] sm:$0xff]   ;;  %v80_v22 = vsub.s32 0, %v628_v21  ;;  %v201_v54 = vsub.s32 1, %v628_v21  ;;  %v207_v55 = vsub.s32 2, %v628_v21 }
  0x2a   :  { %453 = vmatpush3.bf16.msra.mxu1 %v486_v12  ;;  %v490_v16 = vld [vmem:[#allocation4 + $0x20] sm:$0xff]   ;;  %v491_v17 = vld [vmem:[#allocation4 + $0x28] sm:$0xff]   ;;  %v492_v18 = vld [vmem:[#allocation4 + $0x30] sm:$0xff]  }
  0x2b   :  { %454 = vmatprep.subr.bf16.mxu1 %v566_v0  ;;  %v493_v19 = vld [vmem:[#allocation4 + $0x38] sm:$0xff]   ;;  %v76_v23 = vld [vmem:[%s647_s2] sm:$0xff] }
  0x2c   :  { %435 = vmatpush3.bf16.msra.mxu0 %v479_v2  ;;  %v81_v25 = vrot.slane %v76_v23, %v80_v22  ;;  %v202_v56 = vrot.slane %v76_v23, %v201_v54  ;;  %v208_v58 = vrot.slane %v76_v23, %v207_v55  ;;  %v239_v10 = vld [vmem:[%s649_s4] sm:$0xff] }
  0x2d   :  { %436 = vmatprep.subr.bf16.mxu0 %v566_v0  ;;  %v244_v12 = vrot.slane %v239_v10, %v80_v22 }
  0x2e   :  { %455 = vmatpush3.bf16.msra.mxu1 %v487_v13 }
  0x2f   :  { %456 = vmatprep.subr.bf16.mxu1 %v566_v0 }
  0x30   :  { %437 = vmatpush3.bf16.msra.mxu0 %v480_v3 }
  0x31   :  { %438 = vmatprep.subr.bf16.mxu0 %v566_v0 }
  0x32   :  { %457 = vmatpush3.bf16.msra.mxu1 %v488_v14 }
  0x33   :  { %458 = vmatprep.subr.bf16.mxu1 %v566_v0 }
  0x34   :  { %439 = vmatpush3.bf16.msra.mxu0 %v481_v4 }
  0x35   :  { %440 = vmatprep.subr.bf16.mxu0 %v566_v0 }
  0x36   :  { %459 = vmatpush3.bf16.msra.mxu1 %v489_v15 }
  0x37   :  { %460 = vmatprep.subr.bf16.mxu1 %v566_v0 }
  0x38   :  { %441 = vmatpush3.bf16.msra.mxu0 %v482_v5 }
  0x39   :  { %442 = vmatprep.subr.bf16.mxu0 %v566_v0 }
  0x3a   :  { %461 = vmatpush3.bf16.msra.mxu1 %v490_v16 }
  0x3b   :  { %462 = vmatprep.subr.bf16.mxu1 %v566_v0 }
  0x3c   :  { %443 = vmatpush3.bf16.msra.mxu0 %v483_v6 }
  0x3d   :  { %444 = vmatprep.subr.bf16.mxu0 %v566_v0 }
  0x3e   :  { %463 = vmatpush3.bf16.msra.mxu1 %v491_v17 }
  0x3f   :  { %464 = vmatprep.subr.bf16.mxu1 %v566_v0 }
  0x40   :  { %445 = vmatpush3.bf16.msra.mxu0 %v484_v7 }
  0x41   :  { %446 = vmatprep.subr.bf16.mxu0 %v566_v0 }
  0x42   :  { %465 = vmatpush3.bf16.msra.mxu1 %v492_v18 }
  0x43   :  { %466 = vmatprep.subr.bf16.mxu1 %v566_v0 }
  0x44   :  { %447 = vmatpush3.bf16.msra.mxu0 %v485_v8 }
  0x46   :  { %467 = vmatpush3.bf16.msra.mxu1 %v493_v19 }
  0x47   :  { %449 = vmatmul.mubr.bf16.vlgmr.msra.gmra.mrb[0].mxu0 %v77_v11 }
 0x11a   :  { %v164_v24 = vpop.f32.mrb[0].mxu0 }
 0x11b   :  { %v450_v26 = vpop.f32.mrb[1].mxu0  ;;  %v165_v30 = vadd.f32 %v164_v24, %v81_v25 }
 0x11c   :  { %v167_v27 = vpop.f32.mrb[2].mxu0 }
 0x11d   :  { %v168_v28 = vadd.f32 %v167_v27, %v81_v25  ;;  %v451_v29 = vpop.f32.mrb[3].mxu0 }
 0x11f   :  { %v172_v31 = vmul.f32 0.0, %v168_v28 }
 0x121   :  { %v173_v32 = vadd.f32 %v172_v31, %v165_v30 }
 0x123   :  { %v174_v33 = vrot.slane %v173_v32, 4 }
 0x125   :  { %v175_v34 = vadd.f32 %v174_v33, %v173_v32 }
 0x127   :  { %v176_v35 = vrot.slane %v175_v34, 2 }
 0x129   :  { %v177_v36 = vadd.f32 %v176_v35, %v175_v34 }
 0x12b   :  { %v178_v37 = vrot.slane %v177_v36, 1 }
 0x12d   :  { %v179_v38 = vadd.f32 %v178_v37, %v177_v36 }
 0x12f   :  { %v180_v39 = vmul.f32 0.125, %v179_v38 }
 0x131   :  { %v181_v40 = vsub.f32 %v165_v30, %v180_v39  ;;  %v182_v41 = vsub.f32 %v168_v28, %v180_v39 }
 0x133   :  { %v184_v42 = vmul.f32 0.0, %v182_v41  ;;  %v185_v43 = vmul.f32 %v181_v40, %v181_v40  ;;  %v365_v41 = vrot.slane %v239_v10, %v201_v54 }
 0x135   :  { %v186_v44 = vmul.f32 %v184_v42, %v184_v42 }
 0x137   :  { %v187_v45 = vadd.f32 %v186_v44, %v185_v43  ;;  %v371_v43 = vrot.slane %v239_v10, %v207_v55 }
 0x139   :  { %v188_v46 = vrot.slane %v187_v45, 4 }
 0x13b   :  { %v189_v47 = vadd.f32 %v188_v46, %v187_v45 }
 0x13d   :  { %v190_v48 = vrot.slane %v189_v47, 2 }
 0x13f   :  { %v191_v49 = vadd.f32 %v190_v48, %v189_v47 }
 0x141   :  { %v192_v50 = vrot.slane %v191_v49, 1 }
 0x143   :  { %v193_v51 = vadd.f32 %v192_v50, %v191_v49 }
 0x145   :  { %v194_v52 = vmul.f32 0.125, %v193_v51 }
 0x147   :  { %v195_v53 = vadd.f32 1e-05, %v194_v52 }
 0x149   :  { %494 = vrsqrt.f32 %v195_v53 }
 0x153   :  { %v495_v57 = vpop.eup %494 }
 0x154   :  { %v197_v59 = vmul.f32 %v495_v57, %v181_v40  ;;  %v198_v60 = vmul.f32 %v495_v57, %v184_v42 }
 0x156   :  { %v203_v61 = vmul.f32 %v202_v56, %v197_v59  ;;  %v204_v62 = vmul.f32 %v202_v56, %v198_v60 }
 0x158   :  { %v209_v63 = vadd.f32 %v208_v58, %v203_v61  ;;  %v210_v0 = vadd.f32 %v208_v58, %v204_v62 }
 0x15a   :  { %v402_v1 = vmul.f32 -1.442695, %v209_v63  ;;  %v403_v2 = vmul.f32 -1.442695, %v210_v0 }
 0x15c   :  { %496 = vpow2.f32 %v402_v1 }
 0x15d   :  { %498 = vpow2.f32 %v403_v2 }
 0x166   :  { %v497_v3 = vpop.eup %496 }
 0x167   :  { %v499_v4 = vpop.eup %498  ;;  %v217_v5 = vadd.f32 1.0, %v497_v3 }
 0x168   :  { %v218_v6 = vadd.f32 1.0, %v499_v4 }
 0x169   :  { %500 = vrcp.f32 %v217_v5 }
 0x16a   :  { %502 = vrcp.f32 %v218_v6 }
 0x173   :  { %v501_v7 = vpop.eup %500 }
 0x174   :  { %v503_v8 = vpop.eup %502 }
 0x175   :  { %v240_v9 = vpack.c.bf16 %v503_v8, %v501_v7 }
 0x177   :  { %469 = vmatmul.mubr.bf16.vlgmr.msra.gmra.mrb[0].mxu1 %v240_v9 }
 0x24a   :  { %v327_v11 = vpop.f32.mrb[0].mxu1 }
 0x24b   :  { %v470_v13 = vpop.f32.mrb[1].mxu1  ;;  %v328_v17 = vadd.f32 %v327_v11, %v244_v12 }
 0x24c   :  { %v330_v14 = vpop.f32.mrb[2].mxu1 }
 0x24d   :  { %v331_v15 = vadd.f32 %v330_v14, %v244_v12  ;;  %v471_v16 = vpop.f32.mrb[3].mxu1 }
 0x24f   :  { %v335_v18 = vmul.f32 0.0, %v331_v15 }
 0x251   :  { %v336_v19 = vadd.f32 %v335_v18, %v328_v17 }
 0x253   :  { %v337_v20 = vrot.slane %v336_v19, 4 }
 0x255   :  { %v338_v21 = vadd.f32 %v337_v20, %v336_v19 }
 0x257   :  { %v339_v23 = vrot.slane %v338_v21, 2 }
 0x259   :  { %v340_v24 = vadd.f32 %v339_v23, %v338_v21 }
 0x25b   :  { %v341_v25 = vrot.slane %v340_v24, 1 }
 0x25d   :  { %v342_v26 = vadd.f32 %v341_v25, %v340_v24 }
 0x25f   :  { %v343_v27 = vmul.f32 0.125, %v342_v26 }
 0x261   :  { %v344_v28 = vsub.f32 %v328_v17, %v343_v27  ;;  %v345_v29 = vsub.f32 %v331_v15, %v343_v27 }
 0x263   :  { %v347_v30 = vmul.f32 0.0, %v345_v29  ;;  %v348_v31 = vmul.f32 %v344_v28, %v344_v28 }
 0x265   :  { %v349_v32 = vmul.f32 %v347_v30, %v347_v30 }
 0x267   :  { %v350_v22 = vadd.f32 %v349_v32, %v348_v31 }
 0x269   :  { %v351_v33 = vrot.slane %v350_v22, 4 }
 0x26b   :  { %v352_v34 = vadd.f32 %v351_v33, %v350_v22 }
 0x26d   :  { %v353_v35 = vrot.slane %v352_v34, 2 }
 0x26f   :  { %v354_v36 = vadd.f32 %v353_v35, %v352_v34 }
 0x271   :  { %v355_v37 = vrot.slane %v354_v36, 1 }
 0x273   :  { %v356_v38 = vadd.f32 %v355_v37, %v354_v36 }
 0x275   :  { %v357_v39 = vmul.f32 0.125, %v356_v38 }
 0x277   :  { %v358_v40 = vadd.f32 1e-05, %v357_v39 }
 0x279   :  { %504 = vrsqrt.f32 %v358_v40 }
 0x283   :  { %v505_v42 = vpop.eup %504 }
 0x284   :  { %v360_v44 = vmul.f32 %v505_v42, %v344_v28  ;;  %v361_v45 = vmul.f32 %v505_v42, %v347_v30 }
 0x286   :  { %v366_v46 = vmul.f32 %v365_v41, %v360_v44  ;;  %v367_v47 = vmul.f32 %v365_v41, %v361_v45 }
 0x288   :  { %v372_v48 = vadd.f32 %v371_v43, %v366_v46  ;;  %v373_v49 = vadd.f32 %v371_v43, %v367_v47 }
 0x28a   :  { %v412_v50 = vmul.f32 -1.442695, %v372_v48  ;;  %v413_v51 = vmul.f32 -1.442695, %v373_v49 }
 0x28c   :  { %506 = vpow2.f32 %v412_v50 }
 0x28d   :  { %508 = vpow2.f32 %v413_v51 }
 0x296   :  { %v507_v52 = vpop.eup %506 }
 0x297   :  { %v509_v53 = vpop.eup %508  ;;  %v380_v56 = vadd.f32 1.0, %v507_v52 }
 0x298   :  { %v381_v57 = vadd.f32 1.0, %v509_v53 }
 0x299   :  { %510 = vrcp.f32 %v380_v56 }
 0x29a   :  { %512 = vrcp.f32 %v381_v57 }
 0x2a3   :  { %v511_v58 = vpop.eup %510 }
 0x2a4   :  { %v513_v54 = vpop.eup %512  ;;  %386 = vst [vmem:[%s650_s5] sm:$0xff] %v511_v58 }
 0x2a5   :  { %387 = vst [vmem:[%s650_s5 + $0x8] sm:$0xff] %v513_v54 }
 0x2a6   :  { %392 = vsyncpa [#allocation3], 1 }
 0x2a7   :  { %393 = vsyncpa [#allocation5], 1 }

</bundles_post_ra>
